<compile_context>
chip_gen: v5e
topology: v5e:2x2
jax: 0.10.0
libtpu: 0.0.40
codegen_flags: <defaults>
</compile_context>

<pallas_src>
import functools
import math

import jax
import jax.numpy as jnp
from jax.experimental import pallas as pl
from jax.experimental.pallas import tpu as pltpu

LANES = 128
DEFAULT_LANE_TILE = 32768                 # lanes (pixels) per grid step
_X_BLOCK_BYTES = 2 * 1024 * 1024          # per-pipeline-buffer budget for the logits block


def _pick_lane_tile(num_classes, n_pixels, itemsize, requested):
    """Pick lanes/step: big enough to amortize per-step overhead, small enough for VMEM."""
    budget = _X_BLOCK_BYTES // max(1, num_classes * itemsize)
    budget = max(LANES, (budget // LANES) * LANES)
    lt = max(LANES, min(requested, budget))
    if n_pixels <= lt:
        # Single full-extent block; legal even when n_pixels is not a multiple of 128.
        return n_pixels, 1
    lt = (lt // LANES) * LANES
    return lt, pl.cdiv(n_pixels, lt)


def _ce_sum_kernel(x_ref, t_ref, out_ref, acc_ref, cidx_ref, *, ragged, n_valid_last):
    """One (1, C, LT) logits slab -> per-lane CE accumulated into acc_ref.

    Grid = (N, n_tiles); axis 0 (batch) is parallel, axis 1 (pixel tiles) is the
    reduction axis: acc is zeroed at j == 0 and flushed to out_ref at the last tile.
    """
    j = pl.program_id(1)
    n_tiles = pl.num_programs(1)

    @pl.when(j == 0)
    def _():
        acc_ref[...] = jnp.zeros_like(acc_ref)
        # Channel index per element, staged once per batch row (not per tile).
        cidx_ref[...] = jax.lax.broadcasted_iota(jnp.int32, cidx_ref.shape, 1)

    x = x_ref[...].astype(jnp.float32)        # (1, C, LT)
    t = t_ref[...]                            # (1, 1, LT) int32 class indices
    cidx = cidx_ref[...]                      # (1, C, LT) int32

    m = jnp.max(x, axis=1, keepdims=True)                                   # (1, 1, LT)
    lse = m + jnp.log(jnp.sum(jnp.exp(x - m), axis=1, keepdims=True))       # (1, 1, LT)
    # "Gather" of the target logit: select + sublane sum instead of a real gather.
    picked = jnp.sum(jnp.where(cidx == t, x, 0.0), axis=1, keepdims=True)   # (1, 1, LT)
    loss = lse - picked                                                     # (1, 1, LT)

    is_last = j == n_tiles - 1

    if ragged:
        # Only the final (ragged) tile pays for the lane mask; hot loop is pure VPU math.
        @pl.when(jnp.logical_not(is_last))
        def _():
            acc_ref[...] += loss

        @pl.when(is_last)
        def _():
            lane = jax.lax.broadcasted_iota(jnp.int32, loss.shape, 2)
            acc_ref[...] += jnp.where(lane < n_valid_last, loss, 0.0)
    else:
        acc_ref[...] += loss

    @pl.when(is_last)
    def _():
        out_ref[...] = acc_ref[...]


def cross_entropy_mean(logits, targets, *, lane_tile=DEFAULT_LANE_TILE):
    """mean(CrossEntropy(logits, targets)) via a single Pallas reduction kernel.

    logits:  (N, C, *spatial) float logits
    targets: (N, *spatial) integer class indices in [0, C)
    """
    if logits.ndim < 2:
        raise ValueError("logits must have shape (N, C, *spatial)")
    N, C = logits.shape[0], logits.shape[1]
    P = math.prod(logits.shape[2:]) if logits.ndim > 2 else 1

    # Trailing-dimension reshapes only: no data movement in HBM.
    x = logits.reshape(N, C, P)
    t = targets.reshape(N, 1, P).astype(jnp.int32)

    lt, n_tiles = _pick_lane_tile(C, P, jnp.dtype(logits.dtype).itemsize, lane_tile)
    ragged = (n_tiles > 1) and (P % lt != 0)
    n_valid_last = P - (n_tiles - 1) * lt

    # TODO(synk): for very large class counts, additionally tile the channel axis
    # (two-level reduction) instead of shrinking lane_tile.
    partial = pl.pallas_call(
        functools.partial(_ce_sum_kernel, ragged=ragged, n_valid_last=n_valid_last),
        out_shape=jax.ShapeDtypeStruct((N, 1, lt), jnp.float32),
        grid=(N, n_tiles),
        in_specs=[
            pl.BlockSpec((1, C, lt), lambda n, j: (n, 0, j)),   # logits, native layout
            pl.BlockSpec((1, 1, lt), lambda n, j: (n, 0, j)),   # targets
        ],
        out_specs=pl.BlockSpec((1, 1, lt), lambda n, j: (n, 0, 0)),  # per-n partial sums
        scratch_shapes=[
            pltpu.VMEM((1, 1, lt), jnp.float32),   # per-lane CE accumulator
            pltpu.VMEM((1, C, lt), jnp.int32),     # staged channel-index iota
        ],
        compiler_params=pltpu.CompilerParams(
            dimension_semantics=("parallel", "arbitrary")),
    )(x, t)

    # Tiny final reduction (N * lane_tile f32) + mean division done by XLA.
    return jnp.sum(partial) / jnp.float32(N * P)


def ce_loss(prediction, targets):
    """Equivalent of CELoss(reduction='mean').forward(prediction, targets)."""
    return cross_entropy_mean(prediction, targets)


def _ce_ref(logits, targets):
    """Pure-JAX reference (matches torch.nn.CrossEntropyLoss(reduction='mean'))."""
    num_classes = logits.shape[1]
    x = jnp.moveaxis(logits, 1, -1).reshape(-1, num_classes).astype(jnp.float32)
    t = targets.reshape(-1).astype(jnp.int32)
    lse = jax.scipy.special.logsumexp(x, axis=-1)
    picked = jnp.take_along_axis(x, t[:, None], axis=-1)[:, 0]
    return jnp.mean(lse - picked)


if __name__ == "__main__":
    key = jax.random.PRNGKey(0)
    k1, k2 = jax.random.split(key)

    # NCHW logits + per-pixel integer class targets (segmentation-style CE).
    N, C, H, W = 2, 4, 16, 16
    prediction = jax.random.normal(k1, (N, C, H, W), jnp.float32)
    targets = jax.random.randint(k2, (N, H, W), 0, C, jnp.int32)

    out = ce_loss(prediction, targets)
    out = jax.block_until_ready(out)

    ref = _ce_ref(prediction, targets)
    assert jnp.allclose(out, ref, rtol=1e-5, atol=1e-5), (out, ref)

    print("KERNEL_OK")
</pallas_src>

<mosaic_0001>
module attributes {stable_mosaic.version = 11 : i64} {
  func.func @_ce_sum_kernel(%arg0: i32, %arg1: i32, %arg2: memref<1x4x256xf32, #tpu.memory_space<vmem>>, %arg3: memref<1x1x256xi32, #tpu.memory_space<vmem>>, %arg4: memref<1x1x256xf32, #tpu.memory_space<vmem>>, %arg5: memref<1x1x256xf32, #tpu.memory_space<vmem>>, %arg6: memref<1x4x256xi32, #tpu.memory_space<vmem>>) attributes {dimension_semantics = [#tpu.dimension_semantics<parallel>, #tpu.dimension_semantics<arbitrary>], iteration_bounds = array<i64: 2, 1>, scalar_prefetch = 0 : i64, scratch_operands = 2 : i64, tpu.core_type = #tpu.core_type<tc>, window_params = [{transform_indices = @transform_0, window_bounds = array<i64: 1, 4, 256>}, {transform_indices = @transform_1, window_bounds = array<i64: 1, 1, 256>}, {transform_indices = @transform_2, window_bounds = array<i64: 1, 1, 256>}]} {
    %c0_i32 = arith.constant 0 : i32
    %0 = arith.cmpi eq, %arg1, %c0_i32 : i32
    %1 = arith.extui %0 : i1 to i32
    %c0_i32_0 = arith.constant 0 : i32
    %2 = arith.cmpi ne, %1, %c0_i32_0 : i32
    scf.if %2 {
      %cst_20 = arith.constant 0.000000e+00 : f32
      %28 = vector.broadcast %cst_20 : f32 to vector<1x1x256xf32>
      %c0_21 = arith.constant 0 : index
      %c0_22 = arith.constant 0 : index
      %c0_23 = arith.constant 0 : index
      %29 = vector.load %arg5[%c0_21, %c0_22, %c0_23] : memref<1x1x256xf32, #tpu.memory_space<vmem>>, vector<1x1x256xf32>
      tpu.vector_store %arg5[%c0_21, %c0_22, %c0_23], %28 {strides = array<i32>} : memref<1x1x256xf32, #tpu.memory_space<vmem>>, vector<1x1x256xf32>,
      %30 = tpu.iota {dimensions = array<i32: 1>} : vector<1x4x256xi32>
      %c0_24 = arith.constant 0 : index
      %c0_25 = arith.constant 0 : index
      %c0_26 = arith.constant 0 : index
      %31 = vector.load %arg6[%c0_24, %c0_25, %c0_26] : memref<1x4x256xi32, #tpu.memory_space<vmem>>, vector<1x4x256xi32>
      tpu.vector_store %arg6[%c0_24, %c0_25, %c0_26], %30 {strides = array<i32>} : memref<1x4x256xi32, #tpu.memory_space<vmem>>, vector<1x4x256xi32>,
    } else {
    }
    %c0 = arith.constant 0 : index
    %c0_1 = arith.constant 0 : index
    %c0_2 = arith.constant 0 : index
    %3 = vector.load %arg2[%c0, %c0_1, %c0_2] : memref<1x4x256xf32, #tpu.memory_space<vmem>>, vector<1x4x256xf32>
    %c0_3 = arith.constant 0 : index
    %c0_4 = arith.constant 0 : index
    %c0_5 = arith.constant 0 : index
    %4 = vector.load %arg3[%c0_3, %c0_4, %c0_5] : memref<1x1x256xi32, #tpu.memory_space<vmem>>, vector<1x1x256xi32>
    %c0_6 = arith.constant 0 : index
    %c0_7 = arith.constant 0 : index
    %c0_8 = arith.constant 0 : index
    %5 = vector.load %arg6[%c0_6, %c0_7, %c0_8] : memref<1x4x256xi32, #tpu.memory_space<vmem>>, vector<1x4x256xi32>
    %cst = arith.constant dense<0xFF800000> : vector<1x256xf32>
    %6 = vector.multi_reduction <maximumf>, %3, %cst [1] : vector<1x4x256xf32> to vector<1x256xf32>
    %7 = vector.shape_cast %6 : vector<1x256xf32> to vector<1x1x256xf32>
    %8 = vector.broadcast %7 : vector<1x1x256xf32> to vector<1x4x256xf32>
    %9 = arith.subf %3, %8 : vector<1x4x256xf32>
    %10 = math.exp %9 : vector<1x4x256xf32>
    %cst_9 = arith.constant dense<0.000000e+00> : vector<1x256xf32>
    %11 = vector.multi_reduction <add>, %10, %cst_9 [1] : vector<1x4x256xf32> to vector<1x256xf32>
    %12 = vector.shape_cast %11 : vector<1x256xf32> to vector<1x1x256xf32>
    %13 = math.log %12 : vector<1x1x256xf32>
    %14 = arith.addf %7, %13 : vector<1x1x256xf32>
    %15 = vector.broadcast %4 : vector<1x1x256xi32> to vector<1x4x256xi32>
    %16 = arith.cmpi eq, %5, %15 : vector<1x4x256xi32>
    %cst_10 = arith.constant 0.000000e+00 : f32
    %17 = vector.broadcast %cst_10 : f32 to vector<1x4x256xf32>
    %18 = arith.select %16, %3, %17 : vector<1x4x256xi1>, vector<1x4x256xf32>
    %cst_11 = arith.constant dense<0.000000e+00> : vector<1x256xf32>
    %19 = vector.multi_reduction <add>, %18, %cst_11 [1] : vector<1x4x256xf32> to vector<1x256xf32>
    %20 = vector.shape_cast %19 : vector<1x256xf32> to vector<1x1x256xf32>
    %21 = arith.subf %14, %20 : vector<1x1x256xf32>
    %c0_i32_12 = arith.constant 0 : i32
    %22 = arith.cmpi eq, %arg1, %c0_i32_12 : i32
    %c0_13 = arith.constant 0 : index
    %c0_14 = arith.constant 0 : index
    %c0_15 = arith.constant 0 : index
    %23 = vector.load %arg5[%c0_13, %c0_14, %c0_15] : memref<1x1x256xf32, #tpu.memory_space<vmem>>, vector<1x1x256xf32>
    %24 = arith.addf %23, %21 : vector<1x1x256xf32>
    %c0_16 = arith.constant 0 : index
    %c0_17 = arith.constant 0 : index
    %c0_18 = arith.constant 0 : index
    %25 = vector.load %arg5[%c0_16, %c0_17, %c0_18] : memref<1x1x256xf32, #tpu.memory_space<vmem>>, vector<1x1x256xf32>
    tpu.vector_store %arg5[%c0_16, %c0_17, %c0_18], %24 {strides = array<i32>} : memref<1x1x256xf32, #tpu.memory_space<vmem>>, vector<1x1x256xf32>,
    %26 = arith.extui %22 : i1 to i32
    %c0_i32_19 = arith.constant 0 : i32
    %27 = arith.cmpi ne, %26, %c0_i32_19 : i32
    scf.if %27 {
      %c0_20 = arith.constant 0 : index
      %c0_21 = arith.constant 0 : index
      %c0_22 = arith.constant 0 : index
      %28 = vector.load %arg5[%c0_20, %c0_21, %c0_22] : memref<1x1x256xf32, #tpu.memory_space<vmem>>, vector<1x1x256xf32>
      %c0_23 = arith.constant 0 : index
      %c0_24 = arith.constant 0 : index
      %c0_25 = arith.constant 0 : index
      %29 = vector.load %arg4[%c0_23, %c0_24, %c0_25] : memref<1x1x256xf32, #tpu.memory_space<vmem>>, vector<1x1x256xf32>
      tpu.vector_store %arg4[%c0_23, %c0_24, %c0_25], %28 {strides = array<i32>} : memref<1x1x256xf32, #tpu.memory_space<vmem>>, vector<1x1x256xf32>,
    } else {
    }
    return
  }
  func.func @transform_0(%arg0: i32, %arg1: i32) -> (i32, i32, i32) {
    %c0_i32 = arith.constant 0 : i32
    %c0_i32_0 = arith.constant 0 : i32
    return %arg0, %c0_i32, %arg1 : i32, i32, i32
  }
  func.func @transform_1(%arg0: i32, %arg1: i32) -> (i32, i32, i32) {
    %c0_i32 = arith.constant 0 : i32
    %c0_i32_0 = arith.constant 0 : i32
    return %arg0, %c0_i32, %arg1 : i32, i32, i32
  }
  func.func @transform_2(%arg0: i32, %arg1: i32) -> (i32, i32, i32) {
    %c0_i32 = arith.constant 0 : i32
    %c0_i32_0 = arith.constant 0 : i32
    %c0_i32_1 = arith.constant 0 : i32
    return %arg0, %c0_i32, %c0_i32_0 : i32, i32, i32
  }
}

</mosaic_0001>

<bundles_post_ra>
// kernel: tpu_custom_call.1
= control target key start
LH: loop header
LB: loop body
LE: loop exit
PB: predicated region body
PF: predicated region fallthrough
CT: control target
= control target key end

     0   :  { %7 = vsyncpa [#allocation5], 0  ;;  %s887_s0 = inlined_call_operand.hbm [shape: f32[2,4,256], index: 0, kind: input, shape index: {}]   ;;  %s888_s1 = inlined_call_operand.hbm [shape: s32[2,1,256], index: 1, kind: input, shape index: {}]   ;;  %s889_s2 = inlined_call_operand.hbm [shape: f32[2,1,256], index: 2, kind: output, shape index: {}]  }
   0x1   :  { %9 = vsyncpa [#allocation5 + $0x1], 0 }
   0x2   :  { %10 = vsyncpa [#allocation8], 0 }
   0x3   :  { %12 = vsyncpa [#allocation8 + $0x1], 0 }
   0x4   :  { %13 = vsyncpa [#allocation6], 0 }
   0x5   :  { %15 = vsyncpa [#allocation6 + $0x1], 0  ;;  %s723_s9 = smov 0   ;;  %s725_s10 = smov 0  }
   0x6   :  { %s727_s11 = smov 0   ;;  %s729_s12 = smov 0  }
   0x7   :  { %s731_s13 = smov 0   ;;  %s733_s14 = smov 0  }
   0x8 LB: > { %s465_s15 = sadd.s32 4294967295, %s704_s14   ;;  %s466_s16 = sadd.s32 4294967294, %s704_s14   ;;  %s704_s14 = sphi %s733_s14, %s21_s14   ;;  %s700_s13 = sphi %s731_s13, %s901_s13   ;;  %s696_s12 = sphi %s729_s12, %s900_s12   ;;  %s692_s11 = sphi %s727_s11, %s899_s11   ;;  %s688_s10 = sphi %s725_s10, %s898_s10   ;;  %s684_s9 = sphi %s723_s9, %s897_s9  }
   0x9   : > { %s33_s17 = sadd.s32 1, %s700_s13  ;;  %s42_s18 = sadd.s32 1, %s692_s11 }
   0xa   : > { %p35_p0 = scmp.ge.s32.totalorder %s33_s17, 2  ;;  %p49_p1 = scmp.ne.s32.totalorder %s692_s11, %s688_s10 }
   0xb   : > { %p50_p2 = scmp.eq.s32.totalorder %s704_s14, 0  ;;  %p55_p3 = scmp.ne.s32.totalorder %s688_s10, %s684_s9 }
   0xc   : > { %s903_s17 = smov (%p35_p0, %s33_s17), 0  ;;  %p56_p5 = scmp.eq.s32.totalorder %s465_s15, 0 }
   0xd   : > { %p764_p4 = por %p50_p2, %p49_p1  ;;  %s37_s20 = ssub.s32 %s700_s13, %s903_s17 }
   0xe   : > { %p107_p6 = scmp.eq.s32.totalorder %s465_s15, 1  ;;  %p40_p7 = scmp.eq.s32.totalorder %s37_s20, 0 }
   0xf   : > { %p770_p8 = por %p56_p5, %p55_p3  ;;  %p113_p10 = scmp.eq.s32.totalorder %s466_s16, 1 }
  0x10   : > { %p774_p9 = por %p107_p6, %p49_p1  ;;  %p468_p12 = scmp.ge.s32.totalorder %s704_s14, 2 }
  0x11   : > { %s779_s23 = scalar_select %p40_p7, %s692_s11, %s42_s18  }
  0x12   : > { %p781_p11 = por %p113_p10, %p55_p3  ;;  %p500_p13 = scmp.lt.s32.totalorder %s704_s14, 2 }
  0x13   : > { %s133_s25 = sand.u32 1, %s692_s11   ;;  %s482_s27 = sshll.u32 %s700_s13, 3 }
  0x14   : > { %s469_s26 = sshll.u32 %s133_s25, 3  ;;  %s144_s30 = scalar_lea.hbm %s887_s0, %s482_s27 }
  0x15   : > { %s137_s3 = scalar_lea.vmem [#allocation4], %s469_s26  ;;  %s146_s5 = sshll.u32 %s144_s30, 4  ;;  %s147_s5 = int_to_ptr.hbm [resolvable:$true] %s146_s5 }
  0x16   : > { %s148_s4 = sshll.u32 %s137_s3, 4  ;;  %p794_p0 = pnand %p500_p13, %p764_p4  ;;  %s149_s4 = int_to_ptr.vmem [resolvable:$true] %s148_s4 }
  0x17   : > { %p474_p1 = scmp.ge.s32.totalorder %s704_s14, 1  ;;  %p174_p2 = scmp.lt.s32.totalorder %s704_s14, 3 }
  0x18   : > { %s134_s7 = scalar_lea.sflag [#allocation5], %s133_s25  ;;  %s472_s8 = sshll.u32 %s133_s25, 1 }
  0x19   : > { %492 = dma.hbm_to_vmem [thread:$0]  (!%p794_p0), %s147_s5, 128, %s149_s4, %s134_s7  }
  0x1a   : > { %p175_p3 = pnand %p474_p1, %p174_p2  ;;  %s473_s15 = sshll.u32 %s700_s13, 1 }
  0x1b   : > { %s165_s20 = scalar_lea.hbm %s888_s1, %s473_s15  ;;  %s159_s26 = scalar_lea.vmem [#allocation7], %s472_s8 }
  0x1c   : > { %s169_s19 = sshll.u32 %s159_s26, 4  ;;  %s167_s27 = sshll.u32 %s165_s20, 4  ;;  %s170_s19 = int_to_ptr.vmem [resolvable:$true] %s169_s19  ;;  %s168_s27 = int_to_ptr.hbm [resolvable:$true] %s167_s27 }
  0x1d   : > { %s156_s28 = scalar_lea.sflag [#allocation8], %s133_s25  ;;  %178 = sbr.rel (%p175_p3) target bundleno = 124 (0x7c), region = 28 }
  0x1e   : > { %495 = dma.hbm_to_vmem [thread:$0]  (!%p794_p0), %s168_s27, 32, %s170_s19, %s156_s28  }
  0x1f   : > { %s809_s29 = sand.u32 (!%p175_p3), 1, %s688_s10  }
  0x20   : > { %s475_s30 = sshll.u32 (!%p175_p3), %s809_s29, 3  ;;  %s181_s3 = scalar_lea.sflag (!%p175_p3), [#allocation5], %s809_s29 }
  0x21   : > { %s184_s4 = scalar_lea.vmem (!%p175_p3), [#allocation4], %s475_s30 }
  0x22   : > { %671 = dma.done.wait (%p770_p8), %s181_s3, 128  }
  0x23   : > { %673 = vsyncadd (%p770_p8), %s181_s3, 4294967168  ;;  %s476_s25 = sshll.u32 %s809_s29, 1  ;;  %s191_s5 = scalar_lea.sflag [#allocation8], %s809_s29 }
  0x24   : > { %s194_s6 = scalar_lea.vmem [#allocation7], %s476_s25 }
  0x25   : > { %675 = dma.done.wait (%p770_p8), %s191_s5, 32  }
  0x26   : > { %677 = vsyncadd (%p770_p8), %s191_s5, 4294967264  ;;  %v239_v0 = vld [vmem:[%s184_s4] sm:$0xff]  ;;  %vm248_vm0 = vcmask 1043456   ;;  %v227_v18 = vlaneseq  ;;  %v240_v19 = vld [vmem:[%s194_s6] sm:$0x3]  ;;  %v707_v25 = vmov 0.0  }
  0x27   : > { %243 = vst [vmem:[#allocation1] ss:$2 sm:$0xff] %v239_v0  ;;  %v706_v23 = vmov 839922192   ;;  %v298_v27 = vperm.slane %v240_v19, 1  ;;  %v297_v30 = vperm.slane %v240_v19, 0 }
  0x28   : > { %vm831_vm1 = vcmp.lt.s32.totalorder %v227_v18, 256  ;;  %v235_v24 = vunpack.c.l.s4 %v706_v23  ;;  %v233_v28 = vshrl.u32 %v227_v18, 7  ;;  %vm329_vm3 = vcmask 1040384   ;;  %s479_s21 = sshll.u32 %s696_s12, 1  ;;  %s220_s16 = scalar_lea.vmem [#allocation9], %s476_s25 }
  0x29   : > { %231 = vst.msk [vmem:[#allocation2] sm:$0x3] %vm831_vm1, %v707_v25  ;;  %v299_v31 = vrot.slane %v298_v27, 4  ;;  %s354_s15 = scalar_lea.hbm %s889_s2, %s479_s21  ;;  %s356_s18 = sshll.u32 %s220_s16, 4  ;;  %s357_s18 = int_to_ptr.vmem [resolvable:$true] %s356_s18 }
  0x2a   : > { %v236_v29 = vunpack.c.0.s8 %v235_v24  ;;  %s358_s20 = sshll.u32 %s354_s15, 4  ;;  %s344_s12 = scalar_lea.sflag [#allocation6], %s809_s29  ;;  %s359_s20 = int_to_ptr.hbm [resolvable:$true] %s358_s20 }
  0x2b   : > { %v300_v34 = vsel %vm248_vm0, %v297_v30, %v299_v31  ;;  %s632_s26 = sshra.s32 %s359_s20, 4  ;;  %s638_s30 = scalar_lea.hbm %s889_s2, 4  ;;  %s633_s26 = int_to_ptr.hbm [resolvable:$true] %s632_s26 }
  0x2c   : > { %v237_v32 = vperm.slane %v233_v28, %v236_v29  ;;  %s634_s19 = scalar_lea.hbm %s633_s26, 2  ;;  %p639_p7 = scmp.lt.s32.totalorder %s633_s26, %s889_s2 }
  0x2d   : > { %p635_p4 = scmp.ne.s32.totalorder %s633_s26, %s634_s19  ;;  %p640_p8 = scmp.lt.s32.totalorder %s638_s30, %s634_s19 }
  0x2e   : > { %v244_v1 = vld.sshfl [vmem:[#allocation1] sm:$0xff pattern:$0x75316420]  ;;  %v245_v2 = vld.sshfl [vmem:[#allocation1 + $0x8] sm:$0xff pattern:$0x75316420]  ;;  %vm301_vm2 = vcmp.eq.s32.totalorder %v237_v32, %v300_v34 }
  0x2f   : > { %v249_v3 = vsel %vm248_vm0, %v244_v1, -inf  ;;  %v256_v4 = vsel %vm248_vm0, %v245_v2, -inf  ;;  %v302_v35 = vsel %vm301_vm2, %v239_v0, 0.0  ;;  %p636_p5 = pnand %p635_p4, %p774_p9  ;;  %p641_p10 = por %p640_p8, %p639_p7 }
  0x30   : > { %v250_v5 = vrot.slane %v249_v3, 4  ;;  %v257_v6 = vrot.slane %v256_v4, 4 }
  0x31   : > { %p637_p6 = pneg %p636_p5 }
  0x32   : > { %v251_v7 = vmax.f32 %v249_v3, %v250_v5  ;;  %v258_v8 = vmax.f32 %v256_v4, %v257_v6 }
  0x33   : > { %p642_p13 = pnand %p641_p10, %p637_p6 }
  0x34   : > { %v252_v9 = vrot.slane %v251_v7, 2  ;;  %v259_v10 = vrot.slane %v258_v8, 2 }
  0x36   : > { %v253_v11 = vmax.f32 %v251_v7, %v252_v9  ;;  %v260_v12 = vmax.f32 %v258_v8, %v259_v10 }
  0x38   : > { %v254_v13 = vrot.slane %v253_v11, 1  ;;  %v261_v14 = vrot.slane %v260_v12, 1 }
  0x3a   : > { %v262_v15 = vmax.f32 %v260_v12, %v261_v14  ;;  %v827_v16 = vmax.f32 %v253_v11, %v254_v13  ;;  %v325_v12 = vld [vmem:[#allocation2] sm:$0x3] }
  0x3c   : > { %v265_v17 = vrot.slane %v262_v15, 4 }
  0x3e   : > { %v266_v20 = vsel %vm248_vm0, %v827_v16, %v265_v17 }
  0x3f   : > { %v268_v21 = vsub.f32 %v239_v0, %v266_v20 }
  0x41   : > { %v269_v26 = vmul.f32 1.442695, %v268_v21 }
  0x43   : > { %552 = vpow2.f32 %v269_v26 }
  0x49   : > { %v553_v33 = vpop.eup %552 }
  0x4a   : > { %272 = vst [vmem:[#allocation1] ss:$2 sm:$0xff] %v553_v33 }
  0x51   : > { %v273_v36 = vld.sshfl [vmem:[#allocation1] sm:$0xff pattern:$0x75316420]  ;;  %v274_v37 = vld.sshfl [vmem:[#allocation1 + $0x8] sm:$0xff pattern:$0x75316420] }
  0x52   : > { %v277_v38 = vsel %vm248_vm0, %v273_v36, 0.0  ;;  %v284_v39 = vsel %vm248_vm0, %v274_v37, 0.0  ;;  %304 = vst [vmem:[#allocation1] ss:$2 sm:$0xff] %v302_v35 }
  0x53   : > { %v278_v40 = vrot.slane %v277_v38, 4  ;;  %v285_v41 = vrot.slane %v284_v39, 4 }
  0x55   : > { %v279_v42 = vadd.f32 %v278_v40, %v277_v38  ;;  %v286_v43 = vadd.f32 %v285_v41, %v284_v39 }
  0x57   : > { %v280_v44 = vrot.slane %v279_v42, 2  ;;  %v287_v45 = vrot.slane %v286_v43, 2 }
  0x59   : > { %v281_v46 = vadd.f32 %v280_v44, %v279_v42  ;;  %v288_v47 = vadd.f32 %v287_v45, %v286_v43  ;;  %v305_v48 = vld.sshfl [vmem:[#allocation1] sm:$0xff pattern:$0x75316420]  ;;  %v306_v49 = vld.sshfl [vmem:[#allocation1 + $0x8] sm:$0xff pattern:$0x75316420] }
  0x5a   : > { %v309_v50 = vsel %vm248_vm0, %v305_v48, 0.0  ;;  %v316_v51 = vsel %vm248_vm0, %v306_v49, 0.0 }
  0x5b   : > { %v282_v52 = vrot.slane %v281_v46, 1  ;;  %v289_v53 = vrot.slane %v288_v47, 1  ;;  %v310_v54 = vrot.slane %v309_v50, 4  ;;  %v317_v55 = vrot.slane %v316_v51, 4 }
  0x5d   : > { %v283_v56 = vadd.f32 %v282_v52, %v281_v46  ;;  %v290_v57 = vadd.f32 %v289_v53, %v288_v47  ;;  %v311_v58 = vadd.f32 %v310_v54, %v309_v50  ;;  %v318_v59 = vadd.f32 %v317_v55, %v316_v51 }
  0x5f   : > { %554 = vlog2.f32 %v290_v57  ;;  %v312_v60 = vrot.slane %v311_v58, 2  ;;  %v319_v61 = vrot.slane %v318_v59, 2 }
  0x60   : > { %556 = vlog2.f32 %v283_v56 }
  0x61   : > { %v320_v62 = vadd.f32 %v319_v61, %v318_v59  ;;  %v313_v63 = vadd.f32 %v312_v60, %v311_v58 }
  0x63   : > { %v321_v0 = vrot.slane %v320_v62, 1  ;;  %v314_v4 = vrot.slane %v313_v63, 1 }
  0x65   : > { %v555_v1 = vpop.eup %554  ;;  %v322_v7 = vadd.f32 %v321_v0, %v320_v62  ;;  %v315_v9 = vadd.f32 %v314_v4, %v313_v63 }
  0x66   : > { %v557_v2 = vpop.eup %556  ;;  %v294_v3 = vmul.f32 0.6931472, %v555_v1 }
  0x67   : > { %v292_v5 = vmul.f32 0.6931472, %v557_v2 }
  0x68   : > { %v296_v6 = vadd.f32 %v294_v3, %v262_v15 }
  0x69   : > { %v295_v8 = vadd.f32 %v292_v5, %v827_v16 }
  0x6a   : > { %v324_v10 = vsub.f32 %v296_v6, %v322_v7 }
  0x6b   : > { %v323_v11 = vsub.f32 %v295_v8, %v315_v9 }
  0x6c   : > { %v328_v13 = vrot.slane %v324_v10, 7 }
  0x6e   : > { %v330_v14 = vsel %vm329_vm3, %v323_v11, %v328_v13 }
  0x6f   : > { %v332_v17 = vadd.f32 %v330_v14, %v325_v12 }
  0x71   : > { %337 = vst.msk [vmem:[#allocation2] sm:$0x3] %vm831_vm1, %v332_v17 }
  0x78   : > { %v341_v15 = vld [vmem:[#allocation2] sm:$0x3] }
  0x79   : > { %342 = vst.msk [vmem:[%s220_s16] sm:$0x3] %vm831_vm1, %v341_v15 }
  0x7a   : > { %645 = shalt.err (!%p642_p13)
}
  0x7b   : > { %487 = dma.vmem_to_hbm [thread:$0]  (%p774_p9), %s357_s18, 32, %s359_s20, %s344_s12  }
  0x7c PF: > { %s370_s29 = sand.u32 1, %s684_s9   ;;  %p497_p0 = pnand %p468_p12, %p781_p11 }
  0x7d   : > { %s371_s25 = scalar_lea.sflag [#allocation6], %s370_s29 }
  0x7e   : > { %p498_p1 = pneg %p497_p0 }
  0x80   : > { %679 = dma.done.wait (%p498_p1), %s371_s25, 32  }
  0x81   : > { %681 = vsyncadd (%p498_p1), %s371_s25, 4294967264  ;;  %s21_s14 = sadd.s32 1, %s704_s14   ;;  %s897_s9 = smov %s688_s10 }
  0x82   : > { %p18_p2 = scmp.ge.s32.totalorder %s21_s14, 4   ;;  %s898_s10 = smov %s692_s11 }
  0x83   : > { %s899_s11 = smov %s779_s23  ;;  %s900_s12 = smov %s700_s13 }
  0x84   : > { %s901_s13 = smov %s903_s17  ;;  %20 = sbr.rel (!%p18_p2) target bundleno = 8 (0x8), region = 94 }
  0x89   :  { %377 = vsyncpa [#allocation5], 1 }
  0x8a   :  { %379 = vsyncpa [#allocation5 + $0x1], 1 }
  0x8b   :  { %380 = vsyncpa [#allocation8], 1 }
  0x8c   :  { %382 = vsyncpa [#allocation8 + $0x1], 1 }
  0x8d   :  { %383 = vsyncpa [#allocation6], 1 }
  0x8e   :  { %385 = vsyncpa [#allocation6 + $0x1], 1 }

</bundles_post_ra>
